<compile_context>
chip_gen: v7x
topology: tpu7x:2x2x1
jax: 0.10.0
libtpu: 0.0.40
codegen_flags: <defaults>
</compile_context>

<pallas_src>
import jax
import jax.numpy as jnp
from jax import lax
from jax.experimental import pallas as pl
from jax.experimental.pallas import tpu as pltpu

IN_FEATURES = 28 * 28   # 784  (torch fc1 in_features)
HIDDEN = 64             # torch hidden size
OUT_SIZE = 10           # torch output size

IN_PAD = 896            # 7 * 128 : zero-padded K for layer 1 (exact)
HID_PAD = 128           # hidden padded to full lane width
OUT_PAD = 128           # output padded -> unmasked lane-dense store

_NEG_BIG = -1.0e30      # mask value for padded logit lanes (exp underflows to 0)


def _round_up(n, m):
    return ((n + m - 1) // m) * m


def simple_nn_kernel(x_ref,
                     w1_ref, b1_ref,
                     w2_ref, b2_ref,
                     w3_ref, b3_ref,
                     w4_ref, b4_ref,
                     o_ref):
    # fc1 + relu  (K padded 784->896 with zeros: exact)
    h = jnp.dot(x_ref[...], w1_ref[...], preferred_element_type=jnp.float32)
    h = jnp.maximum(h + b1_ref[...], 0.0)
    # fc2 + relu
    h = jnp.dot(h, w2_ref[...], preferred_element_type=jnp.float32)
    h = jnp.maximum(h + b2_ref[...], 0.0)
    # fc3 + relu
    h = jnp.dot(h, w3_ref[...], preferred_element_type=jnp.float32)
    h = jnp.maximum(h + b3_ref[...], 0.0)
    # fc4 (no activation)
    logits = jnp.dot(h, w4_ref[...], preferred_element_type=jnp.float32)
    logits = logits + b4_ref[...]

    # log_softmax over the real OUT_SIZE logits only: mask padded lanes so the
    # max / exp / sum reductions ignore them (exp of -1e30 - m underflows to 0).
    col = lax.broadcasted_iota(jnp.int32, logits.shape, dimension=1)
    logits = jnp.where(col < OUT_SIZE, logits, _NEG_BIG)
    m = jnp.max(logits, axis=-1, keepdims=True)
    shifted = logits - m
    lse = jnp.log(jnp.sum(jnp.exp(shifted), axis=-1, keepdims=True))
    o_ref[...] = shifted - lse


def _pad_params(params):
    """Zero-pad torch-shaped params to lane-aligned shapes (exact)."""
    w1, b1, w2, b2, w3, b3, w4, b4 = params
    w1p = jnp.zeros((IN_PAD, HID_PAD), jnp.float32).at[:IN_FEATURES, :HIDDEN].set(w1)
    b1p = jnp.zeros((1, HID_PAD), jnp.float32).at[:, :HIDDEN].set(b1)
    w2p = jnp.zeros((HID_PAD, HID_PAD), jnp.float32).at[:HIDDEN, :HIDDEN].set(w2)
    b2p = jnp.zeros((1, HID_PAD), jnp.float32).at[:, :HIDDEN].set(b2)
    w3p = jnp.zeros((HID_PAD, HID_PAD), jnp.float32).at[:HIDDEN, :HIDDEN].set(w3)
    b3p = jnp.zeros((1, HID_PAD), jnp.float32).at[:, :HIDDEN].set(b3)
    w4p = jnp.zeros((HID_PAD, OUT_PAD), jnp.float32).at[:HIDDEN, :OUT_SIZE].set(w4)
    b4p = jnp.zeros((1, OUT_PAD), jnp.float32).at[:, :OUT_SIZE].set(b4)
    return w1p, b1p, w2p, b2p, w3p, b3p, w4p, b4p


def simple_nn_forward(x, params, *, tm=256):
    """x: (B, 784) float32 -> (B, OUT_SIZE) log-probabilities."""
    B = x.shape[0]
    # Batch tile: multiple of 8 (sublane), capped at tm; batch padded to a tile multiple.
    TM = min(tm, _round_up(B, 8))
    B_pad = _round_up(B, TM)
    n_tiles = B_pad // TM

    x_pad = jnp.zeros((B_pad, IN_PAD), jnp.float32).at[:B, :IN_FEATURES].set(x)
    w1p, b1p, w2p, b2p, w3p, b3p, w4p, b4p = _pad_params(params)

    x_spec = pl.BlockSpec((TM, IN_PAD), lambda i: (i, 0))
    out_spec = pl.BlockSpec((TM, OUT_PAD), lambda i: (i, 0))

    def resident(shape):
        # Full-array block, same block for every batch tile -> stays VMEM-resident.
        return pl.BlockSpec(shape, lambda i: (0, 0))

    flops = 2 * B_pad * (IN_PAD * HID_PAD + 2 * HID_PAD * HID_PAD + HID_PAD * OUT_PAD)
    bytes_accessed = 4 * (B_pad * IN_PAD + B_pad * OUT_PAD
                          + IN_PAD * HID_PAD + 2 * HID_PAD * HID_PAD
                          + HID_PAD * OUT_PAD + 3 * HID_PAD + OUT_PAD)
    transcendentals = B_pad * OUT_PAD  # exp in log_softmax

    out_pad = pl.pallas_call(
        simple_nn_kernel,
        out_shape=jax.ShapeDtypeStruct((B_pad, OUT_PAD), jnp.float32),
        grid=(n_tiles,),
        in_specs=[
            x_spec,
            resident((IN_PAD, HID_PAD)), resident((1, HID_PAD)),
            resident((HID_PAD, HID_PAD)), resident((1, HID_PAD)),
            resident((HID_PAD, HID_PAD)), resident((1, HID_PAD)),
            resident((HID_PAD, OUT_PAD)), resident((1, OUT_PAD)),
        ],
        out_specs=out_spec,
        compiler_params=pltpu.CompilerParams(
            dimension_semantics=("parallel",)),  # batch tiles shard across TCs on v7x
        cost_estimate=pl.CostEstimate(flops=flops,
                                      transcendentals=transcendentals,
                                      bytes_accessed=bytes_accessed),
    )(x_pad, w1p, b1p, w2p, b2p, w3p, b3p, w4p, b4p)

    return out_pad[:B, :OUT_SIZE]


def init_params(key, out_size=OUT_SIZE, hidden=HIDDEN):
    """Deterministic init mimicking nn.Linear's U(-1/sqrt(fan_in), 1/sqrt(fan_in))."""
    dims = [(IN_FEATURES, hidden), (hidden, hidden), (hidden, hidden), (hidden, out_size)]
    params = []
    keys = jax.random.split(key, 2 * len(dims))
    for i, (fan_in, fan_out) in enumerate(dims):
        bound = 1.0 / jnp.sqrt(jnp.float32(fan_in))
        w = jax.random.uniform(keys[2 * i], (fan_in, fan_out),
                               minval=-bound, maxval=bound, dtype=jnp.float32)
        b = jax.random.uniform(keys[2 * i + 1], (1, fan_out),
                               minval=-bound, maxval=bound, dtype=jnp.float32)
        params += [w, b]
    return tuple(params)


def reference_forward(x, params):
    (w1, b1, w2, b2, w3, b3, w4, b4) = params
    h = jnp.maximum(x @ w1 + b1, 0.0)
    h = jnp.maximum(h @ w2 + b2, 0.0)
    h = jnp.maximum(h @ w3 + b3, 0.0)
    logits = h @ w4 + b4
    return jax.nn.log_softmax(logits, axis=1)


if __name__ == "__main__":
    key = jax.random.PRNGKey(0)
    k_x, k_p = jax.random.split(key)
    BATCH = 16
    x = jax.random.normal(k_x, (BATCH, IN_FEATURES), dtype=jnp.float32)
    params = init_params(k_p)

    # tm=8 -> batch tile of 8, grid=(2,): exercises the pipelined batch grid at small B.
    # (Production batches use the default tm=256 for MXU-sized M tiles.)
    out = simple_nn_forward(x, params, tm=8)
    out = jax.block_until_ready(out)

    ref = reference_forward(x, params)
    assert out.shape == (BATCH, OUT_SIZE)
    assert jnp.allclose(out, ref, atol=1e-5, rtol=1e-5), (
        f"max abs err {jnp.max(jnp.abs(out - ref))}")

    print("KERNEL_OK")
</pallas_src>

<mosaic_0001>
module attributes {stable_mosaic.version = 11 : i64} {
  func.func @simple_nn_kernel(%arg0: i32, %arg1: memref<8x896xf32, #tpu.memory_space<vmem>>, %arg2: memref<896x128xf32, #tpu.memory_space<vmem>>, %arg3: memref<1x128xf32, #tpu.memory_space<vmem>>, %arg4: memref<128x128xf32, #tpu.memory_space<vmem>>, %arg5: memref<1x128xf32, #tpu.memory_space<vmem>>, %arg6: memref<128x128xf32, #tpu.memory_space<vmem>>, %arg7: memref<1x128xf32, #tpu.memory_space<vmem>>, %arg8: memref<128x128xf32, #tpu.memory_space<vmem>>, %arg9: memref<1x128xf32, #tpu.memory_space<vmem>>, %arg10: memref<8x128xf32, #tpu.memory_space<vmem>>) attributes {dimension_semantics = [#tpu.dimension_semantics<parallel>], iteration_bounds = array<i64: 2>, scalar_prefetch = 0 : i64, scratch_operands = 0 : i64, tpu.core_type = #tpu.core_type<tc>, window_params = [{transform_indices = @transform_0, window_bounds = array<i64: 8, 896>}, {pipeline_mode = #tpu.pipeline_mode<synchronous>, transform_indices = @transform_1, window_bounds = array<i64: 896, 128>}, {pipeline_mode = #tpu.pipeline_mode<synchronous>, transform_indices = @transform_2, window_bounds = array<i64: 1, 128>}, {pipeline_mode = #tpu.pipeline_mode<synchronous>, transform_indices = @transform_3, window_bounds = array<i64: 128, 128>}, {pipeline_mode = #tpu.pipeline_mode<synchronous>, transform_indices = @transform_4, window_bounds = array<i64: 1, 128>}, {pipeline_mode = #tpu.pipeline_mode<synchronous>, transform_indices = @transform_5, window_bounds = array<i64: 128, 128>}, {pipeline_mode = #tpu.pipeline_mode<synchronous>, transform_indices = @transform_6, window_bounds = array<i64: 1, 128>}, {pipeline_mode = #tpu.pipeline_mode<synchronous>, transform_indices = @transform_7, window_bounds = array<i64: 128, 128>}, {pipeline_mode = #tpu.pipeline_mode<synchronous>, transform_indices = @transform_8, window_bounds = array<i64: 1, 128>}, {transform_indices = @transform_9, window_bounds = array<i64: 8, 128>}]} {
    %c0 = arith.constant 0 : index
    %c0_0 = arith.constant 0 : index
    %0 = vector.load %arg1[%c0, %c0_0] : memref<8x896xf32, #tpu.memory_space<vmem>>, vector<8x896xf32>
    %c0_1 = arith.constant 0 : index
    %c0_2 = arith.constant 0 : index
    %1 = vector.load %arg2[%c0_1, %c0_2] : memref<896x128xf32, #tpu.memory_space<vmem>>, vector<896x128xf32>
    %cst = arith.constant dense<0.000000e+00> : vector<8x128xf32>
    %2 = tpu.matmul %0, %1, %cst {dimension_numbers = #tpu.dot_dimension_numbers<[1], [0], [0], [1], [0, 0, 1, 1], [], []>} : vector<8x896xf32>, vector<896x128xf32>, vector<8x128xf32> -> vector<8x128xf32>
    %c0_3 = arith.constant 0 : index
    %c0_4 = arith.constant 0 : index
    %3 = vector.load %arg3[%c0_3, %c0_4] : memref<1x128xf32, #tpu.memory_space<vmem>>, vector<1x128xf32>
    %4 = vector.broadcast %3 : vector<1x128xf32> to vector<8x128xf32>
    %5 = arith.addf %2, %4 : vector<8x128xf32>
    %cst_5 = arith.constant 0.000000e+00 : f32
    %6 = vector.broadcast %cst_5 : f32 to vector<8x128xf32>
    %7 = arith.maximumf %5, %6 : vector<8x128xf32>
    %c0_6 = arith.constant 0 : index
    %c0_7 = arith.constant 0 : index
    %8 = vector.load %arg4[%c0_6, %c0_7] : memref<128x128xf32, #tpu.memory_space<vmem>>, vector<128x128xf32>
    %cst_8 = arith.constant dense<0.000000e+00> : vector<8x128xf32>
    %9 = tpu.matmul %7, %8, %cst_8 {dimension_numbers = #tpu.dot_dimension_numbers<[1], [0], [0], [1], [0, 0, 1, 1], [], []>} : vector<8x128xf32>, vector<128x128xf32>, vector<8x128xf32> -> vector<8x128xf32>
    %c0_9 = arith.constant 0 : index
    %c0_10 = arith.constant 0 : index
    %10 = vector.load %arg5[%c0_9, %c0_10] : memref<1x128xf32, #tpu.memory_space<vmem>>, vector<1x128xf32>
    %11 = vector.broadcast %10 : vector<1x128xf32> to vector<8x128xf32>
    %12 = arith.addf %9, %11 : vector<8x128xf32>
    %cst_11 = arith.constant 0.000000e+00 : f32
    %13 = vector.broadcast %cst_11 : f32 to vector<8x128xf32>
    %14 = arith.maximumf %12, %13 : vector<8x128xf32>
    %c0_12 = arith.constant 0 : index
    %c0_13 = arith.constant 0 : index
    %15 = vector.load %arg6[%c0_12, %c0_13] : memref<128x128xf32, #tpu.memory_space<vmem>>, vector<128x128xf32>
    %cst_14 = arith.constant dense<0.000000e+00> : vector<8x128xf32>
    %16 = tpu.matmul %14, %15, %cst_14 {dimension_numbers = #tpu.dot_dimension_numbers<[1], [0], [0], [1], [0, 0, 1, 1], [], []>} : vector<8x128xf32>, vector<128x128xf32>, vector<8x128xf32> -> vector<8x128xf32>
    %c0_15 = arith.constant 0 : index
    %c0_16 = arith.constant 0 : index
    %17 = vector.load %arg7[%c0_15, %c0_16] : memref<1x128xf32, #tpu.memory_space<vmem>>, vector<1x128xf32>
    %18 = vector.broadcast %17 : vector<1x128xf32> to vector<8x128xf32>
    %19 = arith.addf %16, %18 : vector<8x128xf32>
    %cst_17 = arith.constant 0.000000e+00 : f32
    %20 = vector.broadcast %cst_17 : f32 to vector<8x128xf32>
    %21 = arith.maximumf %19, %20 : vector<8x128xf32>
    %c0_18 = arith.constant 0 : index
    %c0_19 = arith.constant 0 : index
    %22 = vector.load %arg8[%c0_18, %c0_19] : memref<128x128xf32, #tpu.memory_space<vmem>>, vector<128x128xf32>
    %cst_20 = arith.constant dense<0.000000e+00> : vector<8x128xf32>
    %23 = tpu.matmul %21, %22, %cst_20 {dimension_numbers = #tpu.dot_dimension_numbers<[1], [0], [0], [1], [0, 0, 1, 1], [], []>} : vector<8x128xf32>, vector<128x128xf32>, vector<8x128xf32> -> vector<8x128xf32>
    %c0_21 = arith.constant 0 : index
    %c0_22 = arith.constant 0 : index
    %24 = vector.load %arg9[%c0_21, %c0_22] : memref<1x128xf32, #tpu.memory_space<vmem>>, vector<1x128xf32>
    %25 = vector.broadcast %24 : vector<1x128xf32> to vector<8x128xf32>
    %26 = arith.addf %23, %25 : vector<8x128xf32>
    %27 = tpu.iota {dimensions = array<i32: 1>} : vector<8x128xi32>
    %c10_i32 = arith.constant 10 : i32
    %28 = vector.broadcast %c10_i32 : i32 to vector<8x128xi32>
    %29 = arith.cmpi slt, %27, %28 : vector<8x128xi32>
    %cst_23 = arith.constant -1.000000e+30 : f32
    %30 = vector.broadcast %cst_23 : f32 to vector<8x128xf32>
    %31 = arith.select %29, %26, %30 : vector<8x128xi1>, vector<8x128xf32>
    %cst_24 = arith.constant dense<0xFF800000> : vector<8xf32>
    %32 = vector.multi_reduction <maximumf>, %31, %cst_24 [1] : vector<8x128xf32> to vector<8xf32>
    %33 = vector.shape_cast %32 : vector<8xf32> to vector<8x1xf32>
    %34 = vector.broadcast %33 : vector<8x1xf32> to vector<8x128xf32>
    %35 = arith.subf %31, %34 : vector<8x128xf32>
    %36 = math.exp %35 : vector<8x128xf32>
    %cst_25 = arith.constant dense<0.000000e+00> : vector<8xf32>
    %37 = vector.multi_reduction <add>, %36, %cst_25 [1] : vector<8x128xf32> to vector<8xf32>
    %38 = vector.shape_cast %37 : vector<8xf32> to vector<8x1xf32>
    %39 = math.log %38 : vector<8x1xf32>
    %40 = vector.broadcast %39 : vector<8x1xf32> to vector<8x128xf32>
    %41 = arith.subf %35, %40 : vector<8x128xf32>
    %c0_26 = arith.constant 0 : index
    %c0_27 = arith.constant 0 : index
    %42 = vector.load %arg10[%c0_26, %c0_27] : memref<8x128xf32, #tpu.memory_space<vmem>>, vector<8x128xf32>
    tpu.vector_store %arg10[%c0_26, %c0_27], %41 {strides = array<i32>} : memref<8x128xf32, #tpu.memory_space<vmem>>, vector<8x128xf32>,
    return
  }
  func.func @transform_0(%arg0: i32) -> (i32, i32) {
    %c0_i32 = arith.constant 0 : i32
    %c0_i32_0 = arith.constant 0 : i32
    return %arg0, %c0_i32 : i32, i32
  }
  func.func @transform_1(%arg0: i32) -> (i32, i32) {
    %c0_i32 = arith.constant 0 : i32
    %c0_i32_0 = arith.constant 0 : i32
    %c0_i32_1 = arith.constant 0 : i32
    return %c0_i32, %c0_i32_0 : i32, i32
  }
  func.func @transform_2(%arg0: i32) -> (i32, i32) {
    %c0_i32 = arith.constant 0 : i32
    %c0_i32_0 = arith.constant 0 : i32
    %c0_i32_1 = arith.constant 0 : i32
    return %c0_i32, %c0_i32_0 : i32, i32
  }
  func.func @transform_3(%arg0: i32) -> (i32, i32) {
    %c0_i32 = arith.constant 0 : i32
    %c0_i32_0 = arith.constant 0 : i32
    %c0_i32_1 = arith.constant 0 : i32
    return %c0_i32, %c0_i32_0 : i32, i32
  }
  func.func @transform_4(%arg0: i32) -> (i32, i32) {
    %c0_i32 = arith.constant 0 : i32
    %c0_i32_0 = arith.constant 0 : i32
    %c0_i32_1 = arith.constant 0 : i32
    return %c0_i32, %c0_i32_0 : i32, i32
  }
  func.func @transform_5(%arg0: i32) -> (i32, i32) {
    %c0_i32 = arith.constant 0 : i32
    %c0_i32_0 = arith.constant 0 : i32
    %c0_i32_1 = arith.constant 0 : i32
    return %c0_i32, %c0_i32_0 : i32, i32
  }
  func.func @transform_6(%arg0: i32) -> (i32, i32) {
    %c0_i32 = arith.constant 0 : i32
    %c0_i32_0 = arith.constant 0 : i32
    %c0_i32_1 = arith.constant 0 : i32
    return %c0_i32, %c0_i32_0 : i32, i32
  }
  func.func @transform_7(%arg0: i32) -> (i32, i32) {
    %c0_i32 = arith.constant 0 : i32
    %c0_i32_0 = arith.constant 0 : i32
    %c0_i32_1 = arith.constant 0 : i32
    return %c0_i32, %c0_i32_0 : i32, i32
  }
  func.func @transform_8(%arg0: i32) -> (i32, i32) {
    %c0_i32 = arith.constant 0 : i32
    %c0_i32_0 = arith.constant 0 : i32
    %c0_i32_1 = arith.constant 0 : i32
    return %c0_i32, %c0_i32_0 : i32, i32
  }
  func.func @transform_9(%arg0: i32) -> (i32, i32) {
    %c0_i32 = arith.constant 0 : i32
    %c0_i32_0 = arith.constant 0 : i32
    return %arg0, %c0_i32 : i32, i32
  }
}

</mosaic_0001>

<bundles_post_ra>
// kernel: tpu_custom_call.1
= control target key start
LH: loop header
LB: loop body
LE: loop exit
PB: predicated region body
PF: predicated region fallthrough
CT: control target
= control target key end

     0   :  { %s2485_s0 = inlined_call_operand.hbm [shape: f32[16,896], index: 0, kind: input, shape index: {}]   ;;  %s2486_s1 = inlined_call_operand.hbm [shape: f32[896,128], index: 1, kind: input, shape index: {}]   ;;  %s2487_s2 = inlined_call_operand.vmem [shape: f32[1,128], index: 2, kind: input, shape index: {}]   ;;  %s2488_s3 = inlined_call_operand.hbm [shape: f32[128,128], index: 3, kind: input, shape index: {}]   ;;  %s2489_s4 = inlined_call_operand.vmem [shape: f32[1,128], index: 4, kind: input, shape index: {}]   ;;  %s2490_s5 = inlined_call_operand.hbm [shape: f32[128,128], index: 5, kind: input, shape index: {}]   ;;  %s2491_s6 = inlined_call_operand.vmem [shape: f32[1,128], index: 6, kind: input, shape index: {}]   ;;  %s2492_s7 = inlined_call_operand.hbm [shape: f32[128,128], index: 7, kind: input, shape index: {}]   ;;  %s2493_s8 = inlined_call_operand.vmem [shape: f32[1,128], index: 8, kind: input, shape index: {}]   ;;  %s2494_s9 = inlined_call_operand.hbm [shape: f32[16,128], index: 9, kind: output, shape index: {}]  }
   0x1   :  { %2499 = sst [smem:[#allocation16_spill]] %s2486_s1 }
   0x2   :  { %2500 = sst [smem:[#allocation17_spill]] %s2488_s3 }
   0x3   :  { %2501 = sst [smem:[#allocation18_spill]] %s2494_s9 }
   0x4   :  { %14 = vsyncpa [#allocation3], 0 }
   0x5   :  { %16 = vsyncpa [#allocation3 + $0x1], 0 }
   0x6   :  { %17 = vsyncpa [#allocation6], 0 }
   0x7   :  { %18 = vsyncpa [#allocation9], 0 }
   0x8   :  { %19 = vsyncpa [#allocation4], 0 }
   0x9   :  { %21 = vsyncpa [#allocation4 + $0x1], 0  ;;  %s2137_s30 = smov 0   ;;  %s2139_s10 = smov 0  }
   0xa   :  { %s2141_s11 = smov 0   ;;  %s2143_s12 = smov 0  }
   0xb LB: > { %s2076_s13 = smov [#allocation5]   ;;  %s2158_s15 = sadd.s32 4294967295, %s2074_s12   ;;  %s2074_s12 = sphi %s2143_s12, %s2524_s12   ;;  %s2070_s11 = sphi %s2141_s11, %s2523_s11   ;;  %s2066_s10 = sphi %s2139_s10, %s2522_s10   ;;  %s2062_s30 = sphi %s2137_s30, %s2521_s30  }
   0xc   : > { %s264_s14 = sshll.u32 %s2076_s13, 4  ;;  %p1233_p0 = scmp.ge.s32.totalorder %s2074_s12, 1  ;;  %s2163_s14 = int_to_ptr.vmem [resolvable:$true] %s264_s14 }
   0xd   : > { %p2496_p1 = scmp.eq.s32.totalorder %s2158_s15, 0  ;;  %p252_p2 = scmp.lt.s32.totalorder %s2074_s12, 3 }
   0xe   : > { %s2077_s17 = smov [#allocation8]   ;;  %s2078_s20 = smov [#allocation7]  }
   0xf   : > { %p2165_p3 = pnand %p1233_p0, %p252_p2  ;;  %s296_s18 = sshll.u32 %s2077_s17, 4  ;;  %s2178_s18 = int_to_ptr.vmem [resolvable:$true] %s296_s18 }
  0x10   : > { %s280_s21 = sshll.u32 %s2078_s20, 4  ;;  %s2504_s1 = sld [smem:[#allocation16_spill]]  ;;  %s2180_s21 = int_to_ptr.vmem [resolvable:$true] %s280_s21 }
  0x11   : > { %s2502_s16 = scalar_select %p2165_p3, 1, 0 }
  0x12   : > { %p1782_p5 = pneg %p2165_p3 }
  0x14   : > { %p2174_p6 = pnand %p1782_p5, %p2496_p1 }
  0x16   : > { %s1858_s24 = scalar_lea.hbm %s2504_s1, 14336  ;;  %p2190_p8 = pneg %p2174_p6 }
  0x17   : > { %p1859_p7 = scmp.ne.s32.totalorder %s2504_s1, %s1858_s24  ;;  %p1865_p11 = scmp.lt.u32.totalorder %s1858_s24, %s2504_s1 }
  0x19   : > { %p1861_p9 = pnand %p2190_p8, %p1859_p7 }
  0x1b   : > { %p1862_p10 = pneg %p1861_p9 }
  0x1d   : > { %p1867_p12 = pnand %p1865_p11, %p1862_p10 }
  0x1f   : > { %1870 = shalt.err (!%p1867_p12)
}
  0x20   : > { %s1871_s13 = scalar_lea.vmem %s2163_s14, 14336  ;;  %p1879_p5 = scmp.lt.s32.totalorder %s2163_s14, %s2163_s14 }
  0x21   : > { %p1872_p13 = scmp.ne.s32.totalorder %s2163_s14, %s1871_s13  ;;  %p1880_p4 = scmp.lt.s32.totalorder %s1871_s13, %s1871_s13 }
  0x23   : > { %p1874_p0 = pnand %p1872_p13, %p2190_p8  ;;  %p1881_p7 = por %p1880_p4, %p1879_p5 }
  0x25   : > { %p1875_p2 = pneg %p1874_p0 }
  0x27   : > { %p1882_p9 = pnand %p1881_p7, %p1875_p2 }
  0x29   : > { %1885 = shalt.err (!%p1882_p9)
}
  0x2a   : > { %s2079_s17 = smov 128   ;;  %s2080_s20 = smov 8  }
  0x2b   : > { %1785 = dma.hbm_to_vmem [thread:$0]  (!%p2174_p6), %s2504_s1, 14336, %s2163_s14, [#allocation6], %s2079_s17, %s2079_s17, %s2080_s20  }
  0x2c   : > { %s1886_s26 = scalar_lea.hbm %s2490_s5, 2048 }
  0x2d   : > { %p1887_p4 = scmp.ne.s32.totalorder %s2490_s5, %s1886_s26  ;;  %p1893_p12 = scmp.lt.u32.totalorder %s1886_s26, %s2490_s5 }
  0x2f   : > { %p1889_p10 = pnand %p1887_p4, %p2190_p8 }
  0x31   : > { %p1890_p11 = pneg %p1889_p10 }
  0x33   : > { %p1895_p13 = pnand %p1893_p12, %p1890_p11 }
  0x35   : > { %1898 = shalt.err (!%p1895_p13)
}
  0x36   : > { %s1899_s14 = scalar_lea.vmem %s2178_s18, 2048  ;;  %p1907_p7 = scmp.lt.s32.totalorder %s2178_s18, %s2178_s18 }
  0x37   : > { %p1900_p0 = scmp.ne.s32.totalorder %s2178_s18, %s1899_s14  ;;  %p1908_p9 = scmp.lt.s32.totalorder %s1899_s14, %s1899_s14 }
  0x39   : > { %p1902_p2 = pnand %p1900_p0, %p2190_p8  ;;  %p1909_p4 = por %p1908_p9, %p1907_p7 }
  0x3b   : > { %p1903_p5 = pneg %p1902_p2 }
  0x3d   : > { %p1910_p10 = pnand %p1909_p4, %p1903_p5 }
  0x3f   : > { %1913 = shalt.err (!%p1910_p10)
}
  0x40   : > { %1791 = dma.hbm_to_vmem [thread:$0]  (!%p2174_p6), %s2490_s5, 2048, %s2178_s18, [#allocation9], %s2079_s17, %s2079_s17, %s2080_s20  }
  0x41   : > { %s2506_s3 = sld [smem:[#allocation17_spill]] }
  0x47   : > { %s1914_s25 = scalar_lea.hbm %s2506_s3, 2048 }
  0x48   : > { %p1915_p11 = scmp.ne.s32.totalorder %s2506_s3, %s1914_s25  ;;  %p1921_p0 = scmp.lt.u32.totalorder %s1914_s25, %s2506_s3 }
  0x4a   : > { %p1917_p12 = pnand %p1915_p11, %p2190_p8 }
  0x4c   : > { %p1918_p13 = pneg %p1917_p12 }
  0x4e   : > { %p1923_p2 = pnand %p1921_p0, %p1918_p13 }
  0x50   : > { %1926 = shalt.err (!%p1923_p2)
}
  0x51   : > { %s1927_s18 = scalar_lea.vmem %s2180_s21, 2048  ;;  %p1935_p4 = scmp.lt.s32.totalorder %s2180_s21, %s2180_s21 }
  0x52   : > { %p1928_p5 = scmp.ne.s32.totalorder %s2180_s21, %s1927_s18  ;;  %p1936_p10 = scmp.lt.s32.totalorder %s1927_s18, %s1927_s18 }
  0x54   : > { %p1930_p7 = pnand %p1928_p5, %p2190_p8  ;;  %p1937_p11 = por %p1936_p10, %p1935_p4 }
  0x56   : > { %p1931_p9 = pneg %p1930_p7 }
  0x58   : > { %p1938_p12 = pnand %p1937_p11, %p1931_p9 }
  0x5a   : > { %1941 = shalt.err (!%p1938_p12)
}
  0x5b   : > { %1788 = dma.hbm_to_vmem [thread:$0]  (!%p2174_p6), %s2506_s3, 2048, %s2180_s21, [#allocation6], %s2079_s17, %s2079_s17, %s2080_s20  }
  0x5c   : > { %s2081_s22 = smov [#allocation10]   ;;  %s1942_s26 = scalar_lea.hbm %s2492_s7, 2048 }
  0x5d   : > { %s312_s23 = sshll.u32 %s2081_s22, 4  ;;  %p1943_p13 = scmp.ne.s32.totalorder %s2492_s7, %s1942_s26  ;;  %s313_s23 = int_to_ptr.vmem [resolvable:$true] %s312_s23 }
  0x5e   : > { %p1949_p5 = scmp.lt.u32.totalorder %s1942_s26, %s2492_s7 }
  0x5f   : > { %p1945_p0 = pnand %p1943_p13, %p2190_p8 }
  0x61   : > { %p1946_p2 = pneg %p1945_p0 }
  0x63   : > { %p1951_p7 = pnand %p1949_p5, %p1946_p2 }
  0x65   : > { %1954 = shalt.err (!%p1951_p7)
}
  0x66   : > { %s1955_s21 = scalar_lea.vmem %s313_s23, 2048  ;;  %p1963_p11 = scmp.lt.s32.totalorder %s313_s23, %s313_s23 }
  0x67   : > { %p1956_p9 = scmp.ne.s32.totalorder %s313_s23, %s1955_s21  ;;  %p1964_p12 = scmp.lt.s32.totalorder %s1955_s21, %s1955_s21 }
  0x69   : > { %p1958_p4 = pnand %p1956_p9, %p2190_p8  ;;  %p1965_p1 = por %p1964_p12, %p1963_p11 }
  0x6b   : > { %p1959_p10 = pneg %p1958_p4 }
  0x6d   : > { %p1966_p3 = pnand %p1965_p1, %p1959_p10 }
  0x6f   : > { %1969 = shalt.err (!%p1966_p3)
}
  0x70   : > { %1794 = dma.hbm_to_vmem [thread:$0]  (!%p2174_p6), %s2492_s7, 2048, %s313_s23, [#allocation9], %s2079_s17, %s2079_s17, %s2080_s20  }
  0x71   : > { %s1232_s19 = sadd.s32 4294967294, %s2074_s12   ;;  %s2289_s27 = sadd.s32 1, %s2074_s12  }
  0x72   : > { %s31_s22 = ssub.s32 %s2074_s12, %s2289_s27  ;;  %s34_s24 = sadd.s32 1, %s2070_s11 }
  0x73   : > { %p32_p1 = scmp.eq.s32.totalorder %s31_s22, 0  ;;  %p41_p3 = scmp.ne.s32.totalorder %s2070_s11, %s2066_s10 }
  0x74   : > { %p42_p8 = scmp.eq.s32.totalorder %s2074_s12, 0  ;;  %p47_p13 = scmp.ne.s32.totalorder %s2066_s10, %s2062_s30 }
  0x75   : > { %s2300_s25 = scalar_select %p32_p1, %s2070_s11, %s34_s24  }
  0x76   : > { %p43_p0 = por %p42_p8, %p41_p3  ;;  %p2507_p2 = scmp.eq.s32.totalorder %s2158_s15, 0 }
  0x77   : > { %p239_p6 = scmp.eq.s32.totalorder %s2158_s15, 1  ;;  %p245_p7 = scmp.eq.s32.totalorder %s1232_s19, 1 }
  0x78   : > { %p2304_p5 = por %p2507_p2, %p47_p13  ;;  %p1807_p9 = scmp.lt.s32.totalorder %s2074_s12, 2 }
  0x79   : > { %s329_s17 = sand.u32 1, %s2070_s11   ;;  %p2311_p4 = por %p239_p6, %p41_p3 }
  0x7a   : > { %p2315_p10 = por %p245_p7, %p47_p13  ;;  %s1759_s28 = smul.u32 56, %s329_s17 }
  0x7b   : > { %s2509_s20 = scalar_select %p2311_p4, 1, 0 }
  0x7c   : > { %s2510_s23 = scalar_select %p2315_p10, 1, 0 }
  0x7d   : > { %s1760_s29 = smul.u32 896, %s2074_s12  ;;  %p2320_p11 = pnand %p1807_p9, %p43_p0 }
  0x7e   : > { %s333_s9 = scalar_lea.vmem [#allocation2], %s1759_s28  ;;  %s330_s22 = scalar_lea.sflag [#allocation3], %s329_s17 }
  0x7f   : > { %s2327_s14 = scalar_lea.hbm %s2485_s0, %s1760_s29  ;;  %s341_s19 = sshll.u32 %s333_s9, 4  ;;  %s2329_s19 = int_to_ptr.vmem [resolvable:$true] %s341_s19 }
  0x80   : > { %s1970_s24 = scalar_lea.hbm %s2327_s14, 896  ;;  %p1972_p1 = pneg %p2320_p11 }
  0x81   : > { %p1971_p12 = scmp.ne.s32.totalorder %s2327_s14, %s1970_s24  ;;  %s1975_s21 = scalar_lea.hbm %s2485_s0, 1792 }
  0x82   : > { %p1976_p13 = scmp.lt.u32.totalorder %s2327_s14, %s2485_s0  ;;  %p1977_p0 = scmp.lt.u32.totalorder %s1975_s21, %s1970_s24 }
  0x83   : > { %p1973_p3 = pnand %p1972_p1, %p1971_p12  ;;  %p1979_p6 = scmp.lt.u32.totalorder %s1970_s24, %s2327_s14 }
  0x84   : > { %p1978_p2 = por %p1977_p0, %p1976_p13 }
  0x85   : > { %p1974_p8 = pneg %p1973_p3 }
  0x86   : > { %p1980_p7 = por %p1979_p6, %p1978_p2 }
  0x88   : > { %p1981_p9 = pnand %p1980_p7, %p1974_p8 }
  0x8a   : > { %1984 = shalt.err (!%p1981_p9)
}
  0x8b   : > { %s1985_s17 = scalar_lea.vmem %s2329_s19, 896  ;;  %s2082_s28 = smov [#allocation2]  }
  0x8c   : > { %p1986_p12 = scmp.ne.s32.totalorder %s2329_s19, %s1985_s17  ;;  %s1990_s9 = sshll.u32 %s2082_s28, 4  ;;  %s1991_s9 = int_to_ptr.vmem [resolvable:$false] %s1990_s9 }
  0x8d   : > { %s1992_s1 = scalar_lea.vmem %s1991_s9, 1792  ;;  %p1993_p4 = scmp.lt.s32.totalorder %s2329_s19, %s1991_s9 }
  0x8e   : > { %p1988_p3 = pnand %p1986_p12, %p1972_p1  ;;  %p1994_p13 = scmp.lt.s32.totalorder %s1992_s1, %s1985_s17 }
  0x90   : > { %p1989_p10 = pneg %p1988_p3  ;;  %p1995_p0 = por %p1994_p13, %p1993_p4 }
  0x92   : > { %p1996_p2 = pnand %p1995_p0, %p1989_p10 }
  0x94   : > { %1999 = shalt.err (!%p1996_p2)
}
  0x95   : > { %1798 = dma.hbm_to_vmem [thread:$0]  (!%p2320_p11), %s2327_s14, 896, %s2329_s19, %s330_s22  }
  0x96   : > { %p2512_p8 = scmp.ne.s32.totalorder %s2502_s16, 0 }
  0x97   : > { %s2359_s3 = sand.u32 (!%p2512_p8), 1, %s2066_s10  }
  0x98   : > { %350 = sbr.rel (%p2512_p8) target bundleno = 1429 (0x595), region = 56  ;;  %s353_s18 = scalar_lea.sflag (!%p2512_p8), [#allocation3], %s2359_s3 }
  0x99   : > { %s1761_s24 = smul.u32 (!%p2512_p8), 56, %s2359_s3 }
  0x9b   : > { %s2363_s29 = scalar_lea.vmem (!%p2512_p8), [#allocation2], %s1761_s24 }
  0x9f   : > { %2045 = dma.done.wait (%p2304_p5), %s353_s18, 896  }
  0xa0   : > { %2047 = vsyncadd (%p2304_p5), %s353_s18, 4294966400  ;;  %p2513_p4 = scmp.eq.s32.totalorder %s2158_s15, 0 }
  0xa2   : > { %2049 = dma.done.wait (%p2513_p4), [#allocation6], 16384   ;;  %p2514_p10 = pmov %p2513_p4 }
  0xa3   : > { %p2515_p11 = pmov %p2513_p4 }
  0xa4   : > { %2051 = vsyncadd (%p2514_p10), [#allocation6], 4294950912 }
  0xa5   : > { %2053 = dma.done.wait (%p2515_p11), [#allocation9], 4096   ;;  %p2516_p1 = pmov %p2513_p4 }
  0xa6   : > { %v430_v0 = vld [vmem:[#allocation5 + $0x80] sm:$0xff]  ;;  %v431_v1 = vld [vmem:[#allocation5 + $0x88] sm:$0xff]  ;;  %v432_v11 = vld [vmem:[#allocation5 + $0x90] sm:$0xff]  ;;  %vm2084_vm0 = vmmov 0   ;;  %s1245_s28 = sshll.u32 %s2359_s3, 3  ;;  %s1251_s9 = sshll.u32 %s2158_s15, 7 }
  0xa7   : > { %2055 = vsyncadd (%p2516_p1), [#allocation9], 4294963200  ;;  %v414_v2 = vld [vmem:[#allocation5] sm:$0xff]  ;;  %v1567_v3 = vpack.c.bf16 %v431_v1, %v430_v0  ;;  %v415_v4 = vld [vmem:[#allocation5 + $0x8] sm:$0xff]  ;;  %s406_s1 = scalar_lea.vmem [#allocation11], %s1245_s28  ;;  %s2517_s16 = sld [smem:[#allocation18_spill]] }
  0xa8   : > { %v462_v5 = vld [vmem:[#allocation5 + $0x180] sm:$0xff]  ;;  %v463_v6 = vld [vmem:[#allocation5 + $0x188] sm:$0xff]  ;;  %v1569_v7 = vpack.c.bf16 %v415_v4, %v414_v2  ;;  %v433_v13 = vld [vmem:[#allocation5 + $0x98] sm:$0xff]  ;;  %s1124_s24 = sshll.u32 %s406_s1, 4  ;;  %s1111_s13 = scalar_lea.sflag [#allocation4], %s2359_s3  ;;  %s2443_s24 = int_to_ptr.vmem [resolvable:$true] %s1124_s24 }
  0xa9   : > { %v1599_v8 = vpack.c.bf16 %v463_v6, %v462_v5  ;;  %v446_v9 = vld [vmem:[#allocation5 + $0x100] sm:$0xff]  ;;  %v447_v10 = vld [vmem:[#allocation5 + $0x108] sm:$0xff]  ;;  %1568 = vmatprep.subr.bf16.mxu0 %v1567_v3  ;;  %v416_v14 = vld [vmem:[#allocation5 + $0x10] sm:$0xff]  ;;  %v1571_v16 = vpack.c.bf16 %v433_v13, %v432_v11  ;;  %s2000_s14 = scalar_lea.vmem %s2443_s24, 128  ;;  %p2518_p6 = scmp.ne.s32.totalorder %s2509_s20, 0 }
  0xaa   : > { %v1601_v12 = vpack.c.bf16 %v447_v10, %v446_v9  ;;  %v417_v15 = vld [vmem:[#allocation5 + $0x18] sm:$0xff]  ;;  %1570 = vmatpush3.bf16.msra.mxu0 %v1569_v7  ;;  %v464_v18 = vld [vmem:[#allocation5 + $0x190] sm:$0xff]  ;;  %v434_v23 = vld [vmem:[#allocation5 + $0xa0] sm:$0xff]  ;;  %p2001_p5 = scmp.ne.s32.totalorder %s2443_s24, %s2000_s14  ;;  %s2086_s15 = smov [#allocation11]  }
  0xab   : > { %1600 = vmatprep.subr.bf16.mxu1 %v1599_v8  ;;  %v1573_v17 = vpack.c.bf16 %v417_v15, %v416_v14  ;;  %v465_v19 = vld [vmem:[#allocation5 + $0x198] sm:$0xff]  ;;  %v448_v20 = vld [vmem:[#allocation5 + $0x110] sm:$0xff]  ;;  %v435_v24 = vld [vmem:[#allocation5 + $0xa8] sm:$0xff]  ;;  %1572 = vmatprep.subr.bf16.mxu0 %v1571_v16  ;;  %s2004_s19 = sshll.u32 %s2086_s15, 4  ;;  %s2005_s19 = int_to_ptr.vmem [resolvable:$false] %s2004_s19 }
  0xac   : > { %1602 = vmatpush3.bf16.msra.mxu1 %v1601_v12  ;;  %v1603_v21 = vpack.c.bf16 %v465_v19, %v464_v18  ;;  %v449_v22 = vld [vmem:[#allocation5 + $0x118] sm:$0xff]  ;;  %v1575_v26 = vpack.c.bf16 %v435_v24, %v434_v23  ;;  %v418_v27 = vld [vmem:[#allocation5 + $0x20] sm:$0xff]  ;;  %v419_v28 = vld [vmem:[#allocation5 + $0x28] sm:$0xff]  ;;  %p2002_p7 = pnand %p2001_p5, %p2518_p6  ;;  %s2006_s22 = scalar_lea.vmem %s2005_s19, 256 }
  0xad   : > { %v1605_v25 = vpack.c.bf16 %v449_v22, %v448_v20  ;;  %v466_v29 = vld [vmem:[#allocation5 + $0x1a0] sm:$0xff]  ;;  %v467_v30 = vld [vmem:[#allocation5 + $0x1a8] sm:$0xff]  ;;  %v1577_v33 = vpack.c.bf16 %v419_v28, %v418_v27  ;;  %v436_v35 = vld [vmem:[#allocation5 + $0xb0] sm:$0xff]  ;;  %s2441_s26 = scalar_lea.hbm %s2517_s16, %s1251_s9  ;;  %p2007_p12 = scmp.lt.s32.totalorder %s2443_s24, %s2005_s19 }
  0xae   : > { %1604 = vmatprep.subr.bf16.mxu1 %v1603_v21  ;;  %v450_v31 = vld [vmem:[#allocation5 + $0x120] sm:$0xff]  ;;  %v451_v32 = vld [vmem:[#allocation5 + $0x128] sm:$0xff]  ;;  %1574 = vmatpush3.bf16.msra.mxu0 %v1573_v17  ;;  %v1607_v34 = vpack.c.bf16 %v467_v30, %v466_v29  ;;  %v437_v36 = vld [vmem:[#allocation5 + $0xb8] sm:$0xff]  ;;  %p2003_p9 = pneg %p2002_p7  ;;  %p2008_p3 = scmp.lt.s32.totalorder %s2006_s22, %s2000_s14 }
  0xaf   : > { %v420_v37 = vld [vmem:[#allocation5 + $0x30] sm:$0xff]  ;;  %1576 = vmatprep.subr.bf16.mxu0 %v1575_v26  ;;  %v1609_v38 = vpack.c.bf16 %v451_v32, %v450_v31  ;;  %v1579_v39 = vpack.c.bf16 %v437_v36, %v436_v35  ;;  %v421_v40 = vld [vmem:[#allocation5 + $0x38] sm:$0xff]  ;;  %v438_v46 = vld [vmem:[#allocation5 + $0xc0] sm:$0xff] }
  0xb0   : > { %1606 = vmatpush3.bf16.msra.mxu1 %v1605_v25  ;;  %v468_v41 = vld [vmem:[#allocation5 + $0x1b0] sm:$0xff]  ;;  %v469_v42 = vld [vmem:[#allocation5 + $0x1b8] sm:$0xff]  ;;  %v439_v47 = vld [vmem:[#allocation5 + $0xc8] sm:$0xff]  ;;  %v1581_v48 = vpack.c.bf16 %v421_v40, %v420_v37  ;;  %p2009_p13 = por %p2008_p3, %p2007_p12 }
  0xb1   : > { %1608 = vmatprep.subr.bf16.mxu1 %v1607_v34  ;;  %v1611_v43 = vpack.c.bf16 %v469_v42, %v468_v41  ;;  %v452_v44 = vld [vmem:[#allocation5 + $0x130] sm:$0xff]  ;;  %v453_v45 = vld [vmem:[#allocation5 + $0x138] sm:$0xff]  ;;  %v470_v49 = vld [vmem:[#allocation5 + $0x1c0] sm:$0xff]  ;;  %v1583_v52 = vpack.c.bf16 %v439_v47, %v438_v46 }
  0xb2   : > { %1578 = vmatpush3.bf16.msra.mxu0 %v1577_v33  ;;  %v471_v50 = vld [vmem:[#allocation5 + $0x1c8] sm:$0xff]  ;;  %v1613_v51 = vpack.c.bf16 %v453_v45, %v452_v44  ;;  %v422_v53 = vld [vmem:[#allocation5 + $0x40] sm:$0xff]  ;;  %v440_v58 = vld [vmem:[#allocation5 + $0xd0] sm:$0xff]  ;;  %p2010_p0 = pnand %p2009_p13, %p2003_p9 }
  0xb3   : > { %1580 = vmatprep.subr.bf16.mxu0 %v1579_v39  ;;  %v423_v54 = vld [vmem:[#allocation5 + $0x48] sm:$0xff]  ;;  %v454_v55 = vld [vmem:[#allocation5 + $0x140] sm:$0xff]  ;;  %v1615_v56 = vpack.c.bf16 %v471_v50, %v470_v49  ;;  %v441_v59 = vld [vmem:[#allocation5 + $0xd8] sm:$0xff] }
  0xb4   : > { %1610 = vmatpush3.bf16.msra.mxu1 %v1609_v38  ;;  %v455_v57 = vld [vmem:[#allocation5 + $0x148] sm:$0xff]  ;;  %v472_v60 = vld [vmem:[#allocation5 + $0x1d0] sm:$0xff]  ;;  %v473_v61 = vld [vmem:[#allocation5 + $0x1d8] sm:$0xff]  ;;  %v1585_v62 = vpack.c.bf16 %v423_v54, %v422_v53  ;;  %v1587_v0 = vpack.c.bf16 %v441_v59, %v440_v58 }
  0xb5   : > { %1612 = vmatprep.subr.bf16.mxu1 %v1611_v43  ;;  %v1617_v63 = vpack.c.bf16 %v455_v57, %v454_v55  ;;  %v424_v1 = vld [vmem:[#allocation5 + $0x50] sm:$0xff]  ;;  %v425_v2 = vld [vmem:[#allocation5 + $0x58] sm:$0xff]  ;;  %v1619_v4 = vpack.c.bf16 %v473_v61, %v472_v60  ;;  %v442_v6 = vld [vmem:[#allocation5 + $0xe0] sm:$0xff] }
  0xb6   : > { %1582 = vmatpush3.bf16.msra.mxu0 %v1581_v48  ;;  %v456_v3 = vld [vmem:[#allocation5 + $0x150] sm:$0xff]  ;;  %v457_v5 = vld [vmem:[#allocation5 + $0x158] sm:$0xff]  ;;  %v443_v7 = vld [vmem:[#allocation5 + $0xe8] sm:$0xff]  ;;  %v1589_v10 = vpack.c.bf16 %v425_v2, %v424_v1  ;;  %v2085_v1 = vmov 0.0  }
  0xb7   : > { %1584 = vmatprep.subr.bf16.mxu0 %v1583_v52  ;;  %v474_v8 = vld [vmem:[#allocation5 + $0x1e0] sm:$0xff]  ;;  %v475_v9 = vld [vmem:[#allocation5 + $0x1e8] sm:$0xff]  ;;  %v408_v12 = vld [vmem:[%s2363_s29 + $0x8] sm:$0xff]  ;;  %v1621_v13 = vpack.c.bf16 %v457_v5, %v456_v3  ;;  %v1591_v14 = vpack.c.bf16 %v443_v7, %v442_v6 }
  0xb8   : > { %1614 = vmatpush3.bf16.msra.mxu1 %v1613_v51  ;;  %v426_v11 = vld [vmem:[#allocation5 + $0x60] sm:$0xff]  ;;  %v427_v15 = vld [vmem:[#allocation5 + $0x68] sm:$0xff]  ;;  %v1623_v18 = vpack.c.bf16 %v475_v9, %v474_v8  ;;  %v444_v19 = vld [vmem:[#allocation5 + $0xf0] sm:$0xff]  ;;  %597 = vmatprep.mubr.f32.mxu0 %v408_v12  ;;  %v2083_v51 = vmov 0.0|0.0  }
  0xb9   : > { %1616 = vmatprep.subr.bf16.mxu1 %v1615_v56  ;;  %v458_v16 = vld [vmem:[#allocation5 + $0x160] sm:$0xff]  ;;  %v459_v17 = vld [vmem:[#allocation5 + $0x168] sm:$0xff]  ;;  %v445_v20 = vld [vmem:[#allocation5 + $0xf8] sm:$0xff]  ;;  %v1593_v24 = vpack.c.bf16 %v427_v15, %v426_v11 }
  0xba   : > { %1586 = vmatpush3.bf16.msra.mxu0 %v1585_v62  ;;  %v410_v21 = vld [vmem:[%s2363_s29 + $0x18] sm:$0xff]  ;;  %v476_v22 = vld [vmem:[#allocation5 + $0x1f0] sm:$0xff]  ;;  %v477_v23 = vld [vmem:[#allocation5 + $0x1f8] sm:$0xff]  ;;  %v1625_v25 = vpack.c.bf16 %v459_v17, %v458_v16  ;;  %v1595_v26 = vpack.c.bf16 %v445_v20, %v444_v19 }
  0xbb   : > { %1588 = vmatprep.subr.bf16.mxu0 %v1587_v0  ;;  %667 = vmatprep.mubr.f32.mxu1 %v410_v21  ;;  %v428_v27 = vld [vmem:[#allocation5 + $0x70] sm:$0xff]  ;;  %v429_v28 = vld [vmem:[#allocation5 + $0x78] sm:$0xff]  ;;  %v1627_v30 = vpack.c.bf16 %v477_v23, %v476_v22  ;;  %v494_v32 = vld [vmem:[#allocation5 + $0x280] sm:$0xff] }
  0xbc   : > { %1618 = vmatpush3.bf16.msra.mxu1 %v1617_v63  ;;  %v460_v29 = vld [vmem:[#allocation5 + $0x170] sm:$0xff]  ;;  %v461_v31 = vld [vmem:[#allocation5 + $0x178] sm:$0xff]  ;;  %v495_v33 = vld [vmem:[#allocation5 + $0x288] sm:$0xff]  ;;  %v1597_v34 = vpack.c.bf16 %v429_v28, %v428_v27 }
  0xbd   : > { %1620 = vmatprep.subr.bf16.mxu1 %v1619_v4  ;;  %v1629_v35 = vpack.c.bf16 %v461_v31, %v460_v29  ;;  %v1631_v36 = vpack.c.bf16 %v495_v33, %v494_v32  ;;  %v478_v37 = vld [vmem:[#allocation5 + $0x200] sm:$0xff]  ;;  %v479_v38 = vld [vmem:[#allocation5 + $0x208] sm:$0xff]  ;;  %v496_v39 = vld [vmem:[#allocation5 + $0x290] sm:$0xff] }
  0xbe   : > { %1590 = vmatpush3.bf16.msra.mxu0 %v1589_v10  ;;  %v497_v40 = vld [vmem:[#allocation5 + $0x298] sm:$0xff]  ;;  %v510_v41 = vld [vmem:[#allocation5 + $0x300] sm:$0xff]  ;;  %v511_v42 = vld [vmem:[#allocation5 + $0x308] sm:$0xff]  ;;  %v1633_v44 = vpack.c.bf16 %v479_v38, %v478_v37 }
  0xbf   : > { %1592 = vmatprep.subr.bf16.mxu0 %v1591_v14  ;;  %v407_v43 = vld [vmem:[%s2363_s29] sm:$0xff]  ;;  %v409_v45 = vld [vmem:[%s2363_s29 + $0x10] sm:$0xff]  ;;  %v1635_v46 = vpack.c.bf16 %v497_v40, %v496_v39  ;;  %v1664_v49 = vpack.c.bf16 %v511_v42, %v510_v41  ;;  %v412_v0 = vld [vmem:[%s2363_s29 + $0x28] sm:$0xff] }
  0xc0   : > { %1622 = vmatpush3.bf16.msra.mxu1 %v1621_v13  ;;  %v480_v47 = vld [vmem:[#allocation5 + $0x210] sm:$0xff]  ;;  %v481_v48 = vld [vmem:[#allocation5 + $0x218] sm:$0xff]  ;;  %v498_v50 = vld [vmem:[#allocation5 + $0x2a0] sm:$0xff] }
  0xc1   : > { %1624 = vmatprep.subr.bf16.mxu1 %v1623_v18  ;;  %v499_v52 = vld [vmem:[#allocation5 + $0x2a8] sm:$0xff]  ;;  %v512_v53 = vld [vmem:[#allocation5 + $0x310] sm:$0xff]  ;;  %v513_v54 = vld [vmem:[#allocation5 + $0x318] sm:$0xff]  ;;  %v1637_v55 = vpack.c.bf16 %v481_v48, %v480_v47 }
  0xc2   : > { %1594 = vmatpush3.bf16.msra.mxu0 %v1593_v24  ;;  %v482_v56 = vld [vmem:[#allocation5 + $0x220] sm:$0xff]  ;;  %v1639_v57 = vpack.c.bf16 %v499_v52, %v498_v50  ;;  %v483_v58 = vld [vmem:[#allocation5 + $0x228] sm:$0xff]  ;;  %v1667_v59 = vpack.c.bf16 %v513_v54, %v512_v53  ;;  %v500_v60 = vld [vmem:[#allocation5 + $0x2b0] sm:$0xff] }
  0xc3   : > { %1596 = vmatprep.subr.bf16.mxu0 %v1595_v26  ;;  %v501_v61 = vld [vmem:[#allocation5 + $0x2b8] sm:$0xff]  ;;  %v514_v62 = vld [vmem:[#allocation5 + $0x320] sm:$0xff]  ;;  %v515_v63 = vld [vmem:[#allocation5 + $0x328] sm:$0xff]  ;;  %v1641_v2 = vpack.c.bf16 %v483_v58, %v482_v56 }
  0xc4   : > { %1626 = vmatpush3.bf16.msra.mxu1 %v1625_v25  ;;  %v1643_v3 = vpack.c.bf16 %v501_v61, %v500_v60  ;;  %v484_v4 = vld [vmem:[#allocation5 + $0x230] sm:$0xff]  ;;  %v485_v5 = vld [vmem:[#allocation5 + $0x238] sm:$0xff]  ;;  %v1670_v6 = vpack.c.bf16 %v515_v63, %v514_v62  ;;  %v502_v7 = vld [vmem:[#allocation5 + $0x2c0] sm:$0xff] }
  0xc5   : > { %1628 = vmatprep.subr.bf16.mxu1 %v1627_v30  ;;  %v503_v8 = vld [vmem:[#allocation5 + $0x2c8] sm:$0xff]  ;;  %v516_v9 = vld [vmem:[#allocation5 + $0x330] sm:$0xff]  ;;  %v517_v10 = vld [vmem:[#allocation5 + $0x338] sm:$0xff]  ;;  %v1645_v11 = vpack.c.bf16 %v485_v5, %v484_v4 }
  0xc6   : > { %1598 = vmatpush3.bf16.msra.mxu0 %v1597_v34  ;;  %v1647_v12 = vpack.c.bf16 %v503_v8, %v502_v7  ;;  %v486_v13 = vld [vmem:[#allocation5 + $0x240] sm:$0xff]  ;;  %v487_v14 = vld [vmem:[#allocation5 + $0x248] sm:$0xff]  ;;  %v1673_v15 = vpack.c.bf16 %v517_v10, %v516_v9  ;;  %v504_v16 = vld [vmem:[#allocation5 + $0x2d0] sm:$0xff] }
  0xc7   : > { %1632 = vmatprep.subr.bf16.mxu0 %v1631_v36  ;;  %v505_v17 = vld [vmem:[#allocation5 + $0x2d8] sm:$0xff]  ;;  %v518_v18 = vld [vmem:[#allocation5 + $0x340] sm:$0xff]  ;;  %v519_v19 = vld [vmem:[#allocation5 + $0x348] sm:$0xff]  ;;  %v1649_v20 = vpack.c.bf16 %v487_v14, %v486_v13 }
  0xc8   : > { %1630 = vmatpush3.bf16.msra.mxu1 %v1629_v35  ;;  %v1651_v21 = vpack.c.bf16 %v505_v17, %v504_v16  ;;  %v488_v22 = vld [vmem:[#allocation5 + $0x250] sm:$0xff]  ;;  %v489_v23 = vld [vmem:[#allocation5 + $0x258] sm:$0xff]  ;;  %v1676_v24 = vpack.c.bf16 %v519_v19, %v518_v18  ;;  %v506_v25 = vld [vmem:[#allocation5 + $0x2e0] sm:$0xff] }
  0xc9   : > { %1663 = vmatprep.subr.bf16.mxu1 %v2083_v51  ;;  %598 = vmatmul.mubr.f32.vlgmr.msra.gmra.mrb[0].mxu0 %v407_v43  ;;  %v507_v26 = vld [vmem:[#allocation5 + $0x2e8] sm:$0xff]  ;;  %v520_v27 = vld [vmem:[#allocation5 + $0x350] sm:$0xff]  ;;  %v521_v28 = vld [vmem:[#allocation5 + $0x358] sm:$0xff]  ;;  %v1653_v29 = vpack.c.bf16 %v489_v23, %v488_v22 }
  0xca   : > { %1634 = vmatpush3.bf16.msra.mxu0 %v1633_v44  ;;  %737 = vmatprep.mubr.f32.mxu0 %v412_v0  ;;  %v1655_v30 = vpack.c.bf16 %v507_v26, %v506_v25  ;;  %v490_v31 = vld [vmem:[#allocation5 + $0x260] sm:$0xff]  ;;  %v491_v32 = vld [vmem:[#allocation5 + $0x268] sm:$0xff]  ;;  %v1679_v33 = vpack.c.bf16 %v521_v28, %v520_v27  ;;  %v508_v34 = vld [vmem:[#allocation5 + $0x2f0] sm:$0xff] }
  0xcb   : > { %668 = vmatmul.mubr.f32.vlgmr.msra.gmra.mrb[0].mxu1 %v409_v45  ;;  %1636 = vmatprep.subr.bf16.mxu0 %v1635_v46  ;;  %v509_v35 = vld [vmem:[#allocation5 + $0x2f8] sm:$0xff]  ;;  %v522_v36 = vld [vmem:[#allocation5 + $0x360] sm:$0xff]  ;;  %v523_v37 = vld [vmem:[#allocation5 + $0x368] sm:$0xff]  ;;  %v1657_v38 = vpack.c.bf16 %v491_v32, %v490_v31 }
  0xcc   : > { %1665 = vmatpush3.bf16.msra.mxu1 %v1664_v49  ;;  %1459 = vmatprep.mubr.msk.f32.mxu1 %vm2084_vm0, %v2085_v1  ;;  %v1659_v39 = vpack.c.bf16 %v509_v35, %v508_v34  ;;  %v492_v40 = vld [vmem:[#allocation5 + $0x270] sm:$0xff]  ;;  %v493_v41 = vld [vmem:[#allocation5 + $0x278] sm:$0xff]  ;;  %v1682_v42 = vpack.c.bf16 %v523_v37, %v522_v36  ;;  %v814_v49 = vld [vmem:[#allocation7] sm:$0xff] }
  0xcd   : > { %1666 = vmatprep.subr.bf16.mxu1 %v2083_v51  ;;  %v524_v43 = vld [vmem:[#allocation5 + $0x370] sm:$0xff]  ;;  %v525_v44 = vld [vmem:[#allocation5 + $0x378] sm:$0xff]  ;;  %v1661_v45 = vpack.c.bf16 %v493_v41, %v492_v40  ;;  %v815_v50 = vld [vmem:[#allocation7 + $0x8] sm:$0xff] }
  0xce   : > { %1638 = vmatpush3.bf16.msra.mxu0 %v1637_v55  ;;  %v1685_v46 = vpack.c.bf16 %v525_v44, %v524_v43  ;;  %v411_v47 = vld [vmem:[%s2363_s29 + $0x20] sm:$0xff]  ;;  %v413_v48 = vld [vmem:[%s2363_s29 + $0x30] sm:$0xff]  ;;  %v1688_v53 = vpack.c.bf16 %v815_v50, %v814_v49 }
  0xcf   : > { %1640 = vmatprep.subr.bf16.mxu0 %v1639_v57  ;;  %v816_v52 = vld [vmem:[#allocation7 + $0x10] sm:$0xff]  ;;  %v817_v54 = vld [vmem:[#allocation7 + $0x18] sm:$0xff]  ;;  %v818_v56 = vld [vmem:[#allocation7 + $0x20] sm:$0xff] }
  0xd0   : > { %1668 = vmatpush3.bf16.msra.mxu1 %v1667_v59  ;;  %v1691_v55 = vpack.c.bf16 %v817_v54, %v816_v52  ;;  %v819_v57 = vld [vmem:[#allocation7 + $0x28] sm:$0xff]  ;;  %v820_v59 = vld [vmem:[#allocation7 + $0x30] sm:$0xff]  ;;  %v821_v60 = vld [vmem:[#allocation7 + $0x38] sm:$0xff] }
  0xd1   : > { %1669 = vmatprep.subr.bf16.mxu1 %v2083_v51  ;;  %v1694_v58 = vpack.c.bf16 %v819_v57, %v818_v56  ;;  %v1697_v61 = vpack.c.bf16 %v821_v60, %v820_v59  ;;  %v822_v62 = vld [vmem:[#allocation7 + $0x40] sm:$0xff]  ;;  %v823_v63 = vld [vmem:[#allocation7 + $0x48] sm:$0xff]  ;;  %v828_v8 = vld [vmem:[#allocation7 + $0x70] sm:$0xff] }
  0xd2   : > { %1642 = vmatpush3.bf16.msra.mxu0 %v1641_v2  ;;  %v1700_v0 = vpack.c.bf16 %v823_v63, %v822_v62  ;;  %v824_v2 = vld [vmem:[#allocation7 + $0x50] sm:$0xff]  ;;  %v826_v5 = vld [vmem:[#allocation7 + $0x60] sm:$0xff]  ;;  %v829_v9 = vld [vmem:[#allocation7 + $0x78] sm:$0xff] }
  0xd3   : > { %1644 = vmatprep.subr.bf16.mxu0 %v1643_v3  ;;  %v825_v3 = vld [vmem:[#allocation7 + $0x58] sm:$0xff]  ;;  %v1709_v10 = vpack.c.bf16 %v829_v9, %v828_v8  ;;  %v910_v13 = vld [vmem:[#allocation8 + $0x10] sm:$0xff]  ;;  %v912_v17 = vld [vmem:[#allocation8 + $0x20] sm:$0xff] }
  0xd4   : > { %1671 = vmatpush3.bf16.msra.mxu1 %v1670_v6  ;;  %v1703_v4 = vpack.c.bf16 %v825_v3, %v824_v2  ;;  %v827_v6 = vld [vmem:[#allocation7 + $0x68] sm:$0xff]  ;;  %v916_v23 = vld [vmem:[#allocation8 + $0x40] sm:$0xff]  ;;  %v918_v26 = vld [vmem:[#allocation8 + $0x50] sm:$0xff] }
  0xd5   : > { %1672 = vmatprep.subr.bf16.mxu1 %v2083_v51  ;;  %v1706_v7 = vpack.c.bf16 %v827_v6, %v826_v5  ;;  %v913_v18 = vld [vmem:[#allocation8 + $0x28] sm:$0xff]  ;;  %v919_v27 = vld [vmem:[#allocation8 + $0x58] sm:$0xff]  ;;  %v922_v49 = vld [vmem:[#allocation8 + $0x70] sm:$0xff] }
  0xd6   : > { %1646 = vmatpush3.bf16.msra.mxu0 %v1645_v11  ;;  %v908_v11 = vld [vmem:[#allocation8] sm:$0xff]  ;;  %v1718_v19 = vpack.c.bf16 %v913_v18, %v912_v17  ;;  %v1727_v28 = vpack.c.bf16 %v919_v27, %v918_v26  ;;  %v923_v50 = vld [vmem:[#allocation8 + $0x78] sm:$0xff]  ;;  %v1003_v54 = vld [vmem:[#allocation10 + $0x8] sm:$0xff] }
  0xd7   : > { %1648 = vmatprep.subr.bf16.mxu0 %v1647_v12  ;;  %v909_v12 = vld [vmem:[#allocation8 + $0x8] sm:$0xff]  ;;  %v1733_v52 = vpack.c.bf16 %v923_v50, %v922_v49  ;;  %v1005_v57 = vld [vmem:[#allocation10 + $0x18] sm:$0xff]  ;;  %v1006_v59 = vld [vmem:[#allocation10 + $0x20] sm:$0xff] }
  0xd8   : > { %1674 = vmatpush3.bf16.msra.mxu1 %v1673_v15  ;;  %v1712_v14 = vpack.c.bf16 %v909_v12, %v908_v11  ;;  %v911_v15 = vld [vmem:[#allocation8 + $0x18] sm:$0xff]  ;;  %v1007_v60 = vld [vmem:[#allocation10 + $0x28] sm:$0xff]  ;;  %v1248_v18 = vld [vmem:[%s2491_s6] ss:$0 sm:$0xff] }
  0xd9   : > { %1675 = vmatprep.subr.bf16.mxu1 %v2083_v51  ;;  %v1715_v16 = vpack.c.bf16 %v911_v15, %v910_v13  ;;  %v1009_v62 = vld [vmem:[#allocation10 + $0x38] sm:$0xff]  ;;  %v1011_v2 = vld [vmem:[#allocation10 + $0x48] sm:$0xff]  ;;  %v1016_v15 = vld [vmem:[#allocation10 + $0x70] sm:$0xff] }
  0xda   : > { %1650 = vmatpush3.bf16.msra.mxu0 %v1649_v20  ;;  %v914_v20 = vld [vmem:[#allocation8 + $0x30] sm:$0xff]  ;;  %v1013_v5 = vld [vmem:[#allocation10 + $0x58] sm:$0xff]  ;;  %v1015_v8 = vld [vmem:[#allocation10 + $0x68] sm:$0xff] }
  0xdb   : > { %1652 = vmatprep.subr.bf16.mxu0 %v1651_v21  ;;  %v915_v21 = vld [vmem:[#allocation8 + $0x38] sm:$0xff] }
  0xdc   : > { %1677 = vmatpush3.bf16.msra.mxu1 %v1676_v24  ;;  %v1721_v22 = vpack.c.bf16 %v915_v21, %v914_v20  ;;  %v917_v24 = vld [vmem:[#allocation8 + $0x48] sm:$0xff] }
  0xdd   : > { %1678 = vmatprep.subr.bf16.mxu1 %v2083_v51  ;;  %v1724_v25 = vpack.c.bf16 %v917_v24, %v916_v23  ;;  %v1249_v24 = vld [vmem:[%s2493_s8] ss:$0 sm:$0xff] }
  0xde   : > { %1654 = vmatpush3.bf16.msra.mxu0 %v1653_v29  ;;  %v920_v29 = vld [vmem:[#allocation8 + $0x60] sm:$0xff] }
  0xdf   : > { %1656 = vmatprep.subr.bf16.mxu0 %v1655_v30  ;;  %v921_v30 = vld [vmem:[#allocation8 + $0x68] sm:$0xff] }
  0xe0   : > { %1680 = vmatpush3.bf16.msra.mxu1 %v1679_v33  ;;  %v1730_v31 = vpack.c.bf16 %v921_v30, %v920_v29  ;;  %v1246_v33 = vld [vmem:[%s2487_s2] ss:$0 sm:$0xff] }
  0xe1   : > { %1681 = vmatprep.subr.bf16.mxu1 %v2083_v51 }
  0xe2   : > { %1658 = vmatpush3.bf16.msra.mxu0 %v1657_v38 }
  0xe3   : > { %1660 = vmatprep.subr.bf16.mxu0 %v1659_v39 }
  0xe4   : > { %1683 = vmatpush3.bf16.msra.mxu1 %v1682_v42 }
  0xe5   : > { %1684 = vmatprep.subr.bf16.mxu1 %v2083_v51 }
  0xe6   : > { %1662 = vmatpush3.bf16.msra.mxu0 %v1661_v45 }
  0xe7   : > { %1687 = vmatprep.subr.bf16.mxu0 %v2083_v51 }
  0xe8   : > { %1686 = vmatpush3.bf16.msra.mxu1 %v1685_v46 }
  0xe9   : > { %1711 = vmatprep.subr.bf16.mxu1 %v2083_v51  ;;  %738 = vmatmul.mubr.f32.vlgmr.msra.gmra.mrb[2].mxu0 %v411_v47 }
  0xea   : > { %1494 = vmatprep.mubr.msk.f32.mxu0 %vm2084_vm0, %v2085_v1  ;;  %1689 = vmatpush3.bf16.msra.mxu0 %v1688_v53  ;;  %v1002_v53 = vld [vmem:[#allocation10] sm:$0xff] }
  0xeb   : > { %1460 = vmatmul.mubr.f32.vlgmr.msra.gmra.mrb[2].mxu1 %v413_v48  ;;  %1690 = vmatprep.subr.bf16.mxu0 %v2083_v51  ;;  %v1736_v56 = vpack.c.bf16 %v1003_v54, %v1002_v53 }
  0xec   : > { %1529 = vmatprep.mubr.msk.f32.mxu1 %vm2084_vm0, %v2085_v1  ;;  %1713 = vmatpush3.bf16.msra.mxu1 %v1712_v14 }
  0xed   : > { %1714 = vmatprep.subr.bf16.mxu1 %v2083_v51 }
  0xee   : > { %1692 = vmatpush3.bf16.msra.mxu0 %v1691_v55  ;;  %v1004_v55 = vld [vmem:[#allocation10 + $0x10] sm:$0xff] }
  0xef   : > { %1693 = vmatprep.subr.bf16.mxu0 %v2083_v51 }
  0xf0   : > { %1716 = vmatpush3.bf16.msra.mxu1 %v1715_v16  ;;  %v1017_v16 = vld [vmem:[#allocation10 + $0x78] sm:$0xff] }
  0xf1   : > { %1717 = vmatprep.subr.bf16.mxu1 %v2083_v51  ;;  %v1757_v17 = vpack.c.bf16 %v1017_v16, %v1016_v15 }
  0xf2   : > { %1695 = vmatpush3.bf16.msra.mxu0 %v1694_v58  ;;  %v1739_v58 = vpack.c.bf16 %v1005_v57, %v1004_v55 }
  0xf3   : > { %1696 = vmatprep.subr.bf16.mxu0 %v2083_v51 }
  0xf4   : > { %1719 = vmatpush3.bf16.msra.mxu1 %v1718_v19 }
  0xf5   : > { %1720 = vmatprep.subr.bf16.mxu1 %v2083_v51 }
  0xf6   : > { %1698 = vmatpush3.bf16.msra.mxu0 %v1697_v61  ;;  %v1742_v61 = vpack.c.bf16 %v1007_v60, %v1006_v59 }
  0xf7   : > { %1699 = vmatprep.subr.bf16.mxu0 %v2083_v51 }
  0xf8   : > { %1722 = vmatpush3.bf16.msra.mxu1 %v1721_v22  ;;  %v1095_v22 = vlaneseq }
  0xf9   : > { %1723 = vmatprep.subr.bf16.mxu1 %v2083_v51 }
  0xfa   : > { %1701 = vmatpush3.bf16.msra.mxu0 %v1700_v0  ;;  %v1010_v0 = vld [vmem:[#allocation10 + $0x40] sm:$0xff]  ;;  %v1096_v23 = vand.u32 127, %v1095_v22 }
  0xfb   : > { %1702 = vmatprep.subr.bf16.mxu0 %v2083_v51  ;;  %v1748_v3 = vpack.c.bf16 %v1011_v2, %v1010_v0 }
  0xfc   : > { %1725 = vmatpush3.bf16.msra.mxu1 %v1724_v25  ;;  %vm1097_vm1 = vcmp.lt.s32.totalorder %v1096_v23, 10 }
  0xfd   : > { %1726 = vmatprep.subr.bf16.mxu1 %v2083_v51 }
  0xfe   : > { %1704 = vmatpush3.bf16.msra.mxu0 %v1703_v4  ;;  %v1012_v4 = vld [vmem:[#allocation10 + $0x50] sm:$0xff] }
  0xff   : > { %1705 = vmatprep.subr.bf16.mxu0 %v2083_v51  ;;  %v1751_v6 = vpack.c.bf16 %v1013_v5, %v1012_v4 }
 0x100   : > { %1728 = vmatpush3.bf16.msra.mxu1 %v1727_v28 }
 0x101   : > { %1729 = vmatprep.subr.bf16.mxu1 %v2083_v51 }
 0x102   : > { %1707 = vmatpush3.bf16.msra.mxu0 %v1706_v7  ;;  %v1014_v7 = vld [vmem:[#allocation10 + $0x60] sm:$0xff] }
 0x103   : > { %1708 = vmatprep.subr.bf16.mxu0 %v2083_v51  ;;  %v1754_v9 = vpack.c.bf16 %v1015_v8, %v1014_v7 }
 0x104   : > { %1731 = vmatpush3.bf16.msra.mxu1 %v1730_v31 }
 0x105   : > { %1732 = vmatprep.subr.bf16.mxu1 %v2083_v51 }
 0x106   : > { %1710 = vmatpush3.bf16.msra.mxu0 %v1709_v10  ;;  %v1247_v10 = vld [vmem:[%s2489_s4] ss:$0 sm:$0xff] }
 0x107   : > { %1735 = vmatprep.subr.bf16.mxu0 %v2083_v51 }
 0x108   : > { %1734 = vmatpush3.bf16.msra.mxu1 %v1733_v52 }
 0x19c   : > { %v1286_v32 = vpop.f32.mrb[0].mxu0 }
 0x19d   : > { %v1287_v34 = vpop.f32.mrb[1].mxu0 }
 0x19e   : > { %v1321_v35 = vpop.f32.mrb[0].mxu1  ;;  %v1288_v36 = vadd.f32 %v1287_v34, %v1286_v32 }
 0x19f   : > { %v1322_v37 = vpop.f32.mrb[1].mxu1 }
 0x1a0   : > { %v1323_v38 = vadd.f32 %v1322_v37, %v1321_v35  ;;  %v600_v39 = vadd.f32 %v1288_v36, %v1246_v33 }
 0x1a2   : > { %v670_v40 = vadd.f32 %v1323_v38, %v600_v39 }
 0x1bc   : > { %v1356_v41 = vpop.f32.mrb[2].mxu0 }
 0x1bd   : > { %v1357_v42 = vpop.f32.mrb[3].mxu0 }
 0x1be   : > { %v809_v43 = vpop.f32.mrb[2].mxu1  ;;  %v1358_v44 = vadd.f32 %v1357_v42, %v1356_v41 }
 0x1bf   : > { %v1461_v45 = vpop.f32.mrb[3].mxu1 }
 0x1c0   : > { %v740_v46 = vadd.f32 %v1358_v44, %v670_v40 }
 0x1c2   : > { %v810_v47 = vadd.f32 %v809_v43, %v740_v46 }
 0x1c4   : > { %v813_v48 = vmax.f32 %v810_v47, 0.0 }
 0x1c6   : > { %1495 = vmatmul.mubr.f32.vlgmr.msra.gmra.mrb[4].mxu0 %v813_v48 }
 0x1c7   : > { %1564 = vmatprep.mubr.msk.f32.mxu0 %vm2084_vm0, %v2085_v1  ;;  %1737 = vmatpush3.bf16.msra.mxu0 %v1736_v56  ;;  %v1008_v1 = vld [vmem:[#allocation10 + $0x30] sm:$0xff] }
 0x1c8   : > { %1738 = vmatprep.subr.bf16.mxu0 %v2083_v51  ;;  %v1745_v63 = vpack.c.bf16 %v1009_v62, %v1008_v1 }
 0x1cb   : > { %1740 = vmatpush3.bf16.msra.mxu0 %v1739_v58 }
 0x1cc   : > { %1741 = vmatprep.subr.bf16.mxu0 %v2083_v51 }
 0x1cf   : > { %1743 = vmatpush3.bf16.msra.mxu0 %v1742_v61 }
 0x1d0   : > { %1744 = vmatprep.subr.bf16.mxu0 %v2083_v51 }
 0x1d3   : > { %1746 = vmatpush3.bf16.msra.mxu0 %v1745_v63 }
 0x1d4   : > { %1747 = vmatprep.subr.bf16.mxu0 %v2083_v51 }
 0x1d7   : > { %1749 = vmatpush3.bf16.msra.mxu0 %v1748_v3 }
 0x1d8   : > { %1750 = vmatprep.subr.bf16.mxu0 %v2083_v51 }
 0x1db   : > { %1752 = vmatpush3.bf16.msra.mxu0 %v1751_v6 }
 0x1dc   : > { %1753 = vmatprep.subr.bf16.mxu0 %v2083_v51 }
 0x1df   : > { %1755 = vmatpush3.bf16.msra.mxu0 %v1754_v9 }
 0x1e0   : > { %1756 = vmatprep.subr.bf16.mxu0 %v2083_v51 }
 0x1e3   : > { %1758 = vmatpush3.bf16.msra.mxu0 %v1757_v17 }
 0x299   : > { %v903_v11 = vpop.f32.mrb[4].mxu0 }
 0x29a   : > { %v904_v12 = vadd.f32 %v1247_v10, %v903_v11  ;;  %v1496_v13 = vpop.f32.mrb[5].mxu0 }
 0x29c   : > { %v907_v14 = vmax.f32 %v904_v12, 0.0 }
 0x29e   : > { %1530 = vmatmul.mubr.f32.vlgmr.msra.gmra.mrb[4].mxu1 %v907_v14 }
 0x371   : > { %v997_v19 = vpop.f32.mrb[4].mxu1 }
 0x372   : > { %v998_v20 = vadd.f32 %v1248_v18, %v997_v19  ;;  %v1531_v51 = vpop.f32.mrb[5].mxu1 }
 0x374   : > { %v1001_v21 = vmax.f32 %v998_v20, 0.0 }
 0x376   : > { %1565 = vmatmul.mubr.f32.vlgmr.msra.gmra.mrb[6].mxu0 %v1001_v21 }
 0x449   : > { %v1091_v25 = vpop.f32.mrb[6].mxu0 }
 0x44a   : > { %v1092_v26 = vadd.f32 %v1249_v24, %v1091_v25  ;;  %v1566_v27 = vpop.f32.mrb[7].mxu0 }
 0x44c   : > { %v1098_v28 = vsel %vm1097_vm1, %v1092_v26, -1e+30 }
 0x44d   : > { %1099 = vmax.xlane.f32.xlu0 %v1098_v28 }
 0x4da   : > { %v1100_v29 = vpop.xlane.xlu0 %1099 }
 0x4db   : > { %v1101_v30 = vsub.f32 %v1098_v28, %v1100_v29 }
 0x4dd   : > { %v1102_v31 = vmul.f32 1.442695, %v1101_v30 }
 0x4df   : > { %1854 = vpow2.f32 %v1102_v31 }
 0x4e9   : > { %v1855_v32 = vpop.eup %1854 }
 0x4ea   : > { %1104 = vadd.xlane.f32.xlu0 %v1855_v32 }
 0x577   : > { %v1105_v33 = vpop.xlane.xlu0 %1104 }
 0x578   : > { %1856 = vlog2.f32 %v1105_v33 }
 0x582   : > { %v1857_v34 = vpop.eup %1856 }
 0x583   : > { %v1107_v35 = vmul.f32 0.6931472, %v1857_v34 }
 0x585   : > { %v1108_v36 = vsub.f32 %v1101_v30, %v1107_v35 }
 0x587   : > { %1109 = vst [vmem:[%s406_s1] sm:$0xff] %v1108_v36 }
 0x588   : > { %2013 = shalt.err (!%p2010_p0)
}
 0x589   : > { %s2014_s3 = scalar_lea.hbm %s2441_s26, 128  ;;  %s2018_s28 = scalar_lea.hbm %s2517_s16, 256 }
 0x58a   : > { %p2015_p2 = scmp.ne.s32.totalorder %s2441_s26, %s2014_s3  ;;  %p2019_p10 = scmp.lt.u32.totalorder %s2441_s26, %s2517_s16 }
 0x58b   : > { %p2020_p11 = scmp.lt.u32.totalorder %s2018_s28, %s2014_s3  ;;  %p2022_p5 = scmp.lt.u32.totalorder %s2014_s3, %s2441_s26 }
 0x58c   : > { %p2016_p8 = pnand %p2015_p2, %p2518_p6 }
 0x58d   : > { %p2021_p1 = por %p2020_p11, %p2019_p10 }
 0x58e   : > { %p2017_p4 = pneg %p2016_p8 }
 0x58f   : > { %p2023_p7 = por %p2022_p5, %p2021_p1 }
 0x591   : > { %p2024_p9 = pnand %p2023_p7, %p2017_p4 }
 0x593   : > { %2027 = shalt.err (!%p2024_p9)
}
 0x594   : > { %1780 = dma.vmem_to_hbm [thread:$0]  (%p2518_p6), %s2443_s24, 128, %s2441_s26, %s1111_s13  }
 0x595 PF: > { %s1136_s18 = sand.u32 1, %s2062_s30   ;;  %p2519_p12 = scmp.ne.s32.totalorder %s2510_s23, 0 }
 0x596   : > { %p2520_p3 = scmp.ge.s32.totalorder %s2074_s12, 2  ;;  %s1137_s29 = scalar_lea.sflag [#allocation4], %s1136_s18 }
 0x598   : > { %p1800_p13 = pnand %p2520_p3, %p2519_p12 }
 0x59a   : > { %2057 = dma.done.wait (!%p1800_p13), %s1137_s29, 128  }
 0x59b   : > { %2059 = vsyncadd (!%p1800_p13), %s1137_s29, 4294967168  ;;  %p24_p0 = scmp.ge.s32.totalorder %s2289_s27, 4   ;;  %s2521_s30 = smov %s2066_s10 }
 0x59c   : > { %s2522_s10 = smov %s2070_s11  ;;  %s2523_s11 = smov %s2300_s25 }
 0x59d   : > { %s2524_s12 = smov %s2289_s27  ;;  %26 = sbr.rel (!%p24_p0) target bundleno = 11 (0xb), region = 117 }
 0x5a4   :  { %1142 = vsyncpa [#allocation3], 1 }
 0x5a5   :  { %1144 = vsyncpa [#allocation3 + $0x1], 1 }
 0x5a6   :  { %1145 = vsyncpa [#allocation6], 1 }
 0x5a7   :  { %1146 = vsyncpa [#allocation9], 1 }
 0x5a8   :  { %1147 = vsyncpa [#allocation4], 1 }
 0x5a9   :  { %1149 = vsyncpa [#allocation4 + $0x1], 1 }

</bundles_post_ra>
